<compile_context>
chip_gen: v5e
topology: v5e:2x2
jax: 0.10.0
libtpu: 0.0.40
codegen_flags: <defaults>
</compile_context>

<pallas_src>
import functools

import jax
import jax.numpy as jnp
from jax import lax
from jax.experimental import pallas as pl
from jax.experimental.pallas import tpu as pltpu


def _circle_loss_kernel(
    lab_col_ref,   # (TB, 1)  int32  anchor labels for this tile
    lab_row_ref,   # (1, Bp)  int32  all labels (resident)
    e_hbm_ref,     # (Bp, D)  ANY    normalized embeddings (copied once)
    out_ref,       # (1, 1)   f32    SMEM scalar output
    e_vmem,        # (Bp, D)  VMEM scratch: resident embeddings (single copy)
    copy_sem,      # DMA semaphore
    acc_ref,       # (2,)     f32    SMEM scratch: [loss_sum, valid_count]
    *,
    scale: float,
    margin: float,
    batch: int,
    batch_padded: int,
    tile_b: int,
):
    i = pl.program_id(0)
    n_tiles = pl.num_programs(0)
    TB, Bp = tile_b, batch_padded

    @pl.when(i == 0)
    def _init():
        cp = pltpu.make_async_copy(e_hbm_ref, e_vmem, copy_sem)
        cp.start()
        acc_ref[0] = 0.0
        acc_ref[1] = 0.0
        cp.wait()

    # Anchor tile sliced from the resident block (no duplicate embedding input).
    start = pl.multiple_of(i * TB, TB)
    e_t = e_vmem[pl.ds(start, TB), :]                      # (TB, D)

    # MXU: similarity tile (TB, Bp) = e_t @ e_all.T, f32 accumulation.
    sim = lax.dot_general(
        e_t, e_vmem[...], (((1,), (1,)), ((), ())),
        preferred_element_type=jnp.float32)

    lab_a = lab_col_ref[...]                               # (TB, 1)
    lab_all = lab_row_ref[...]                             # (1, Bp)
    same = lab_a == lab_all                                # (TB, Bp)

    row_g = start + lax.broadcasted_iota(jnp.int32, (TB, Bp), 0)
    col_g = lax.broadcasted_iota(jnp.int32, (TB, Bp), 1)

    pos_mask = same & (row_g != col_g)
    neg_mask = jnp.logical_not(same)
    if batch_padded != batch:                              # compile-time gate
        col_valid = col_g < batch
        pos_mask = pos_mask & col_valid
        neg_mask = neg_mask & col_valid

    m = jnp.float32(margin)
    s = jnp.float32(scale)
    # Circle-loss pair terms (alpha factors are detached in torch; forward
    # value is unchanged).
    ap_term = -s * jnp.maximum(1.0 + m - sim, 0.0) * (sim - 1.0 + m)
    an_term = s * jnp.maximum(sim + m, 0.0) * (sim - m)

    neg_big = jnp.float32(-1e30)
    # Masked logsumexp over positives / negatives of each anchor row.
    # Masked entries are -1e30; after subtracting the row max they underflow
    # to exp(...) == 0, so no second select is needed.
    vals_p = jnp.where(pos_mask, ap_term, neg_big)
    max_p = jnp.max(vals_p, axis=1, keepdims=True)
    sum_p = jnp.sum(jnp.exp(vals_p - max_p), axis=1, keepdims=True)

    vals_n = jnp.where(neg_mask, an_term, neg_big)
    max_n = jnp.max(vals_n, axis=1, keepdims=True)
    sum_n = jnp.sum(jnp.exp(vals_n - max_n), axis=1, keepdims=True)

    n_pos = jnp.sum(pos_mask.astype(jnp.float32), axis=1, keepdims=True)
    n_neg = jnp.sum(neg_mask.astype(jnp.float32), axis=1, keepdims=True)

    lse_p = max_p + jnp.log(sum_p)   # sum_p >= 1 always (max entry gives exp(0))
    lse_n = max_n + jnp.log(sum_n)

    # AllTripletsMiner logsumexp over all triplets of this anchor:
    # each ap term is repeated n_neg times, each an term n_pos times.
    x = (lse_p + lse_n
         + jnp.log(jnp.maximum(n_pos, 1.0))
         + jnp.log(jnp.maximum(n_neg, 1.0)))
    # numerically stable softplus
    loss_i = jnp.maximum(x, 0.0) + jnp.log(1.0 + jnp.exp(-jnp.abs(x)))

    valid = jnp.logical_and(n_pos > 0.0, n_neg > 0.0)
    if batch_padded != batch:
        row_ids = start + lax.broadcasted_iota(jnp.int32, (TB, 1), 0)
        valid = jnp.logical_and(valid, row_ids < batch)
    loss_i = jnp.where(valid, loss_i, 0.0)

    acc_ref[0] = acc_ref[0] + jnp.sum(loss_i)
    acc_ref[1] = acc_ref[1] + jnp.sum(valid.astype(jnp.float32))

    @pl.when(i == n_tiles - 1)
    def _finalize():
        total = acc_ref[0]
        cnt = acc_ref[1]
        # No valid anchors (no triplets) -> the torch module returns 0.
        out_ref[0, 0] = jnp.where(cnt > 0.0, total / jnp.maximum(cnt, 1.0), 0.0)


def _vmem_budget_bytes():
    """Per-generation VMEM budget with headroom for compiler scratch."""
    try:
        cap = int(pltpu.get_tpu_info().vmem_capacity_bytes)
    except Exception:
        cap = 64 * 1024 * 1024          # conservative fallback (v7x-sized)
    return max(cap - 16 * 1024 * 1024, 32 * 1024 * 1024)


def _pick_tile_b(batch_padded, d, itemsize, vmem_budget):
    """Largest anchor tile whose working set fits the VMEM budget."""
    resident = batch_padded * d * itemsize          # single-buffered embeddings
    for tb in (512, 256, 128, 64, 32, 16, 8):
        if tb > batch_padded or batch_padded % tb != 0:
            continue
        # ~12 live (tb, Bp) f32 temporaries in the elementwise chain.
        work = 12 * tb * batch_padded * 4
        if resident + work <= vmem_budget:
            return tb
    return 8


def circle_loss(embeds, labels, *, margin=0.4, scale=80.0,
                normalize_embeds=True, tile_b=None, mxu_dtype=jnp.bfloat16):
    """CircleLoss forward (AllTripletsMiner semantics) via one Pallas kernel."""
    embeds = jnp.asarray(embeds, jnp.float32)
    labels = jnp.asarray(labels, jnp.int32)
    B, D = embeds.shape

    if normalize_embeds:
        # Hoisted out of the kernel (was re-executed on every grid step).
        # x * rsqrt(max(||x||^2, 1e-24)) == x / max(||x||, 1e-12)
        embeds = embeds * lax.rsqrt(
            jnp.maximum(jnp.sum(embeds * embeds, axis=1, keepdims=True), 1e-24))

    e = embeds.astype(mxu_dtype)

    # Pad the batch (lane) dimension to a multiple of 128 so the (TB, B)
    # elementwise chain and the row reductions are lane-dense.
    B_pad = ((B + 127) // 128) * 128
    if B_pad != B:
        e = jnp.pad(e, ((0, B_pad - B), (0, 0)))
        labels_p = jnp.pad(labels, (0, B_pad - B), constant_values=-1)
    else:
        labels_p = labels

    itemsize = jnp.dtype(mxu_dtype).itemsize
    vmem_budget = _vmem_budget_bytes()
    if tile_b is None:
        tile_b = _pick_tile_b(B_pad, D, itemsize, vmem_budget)
    assert B_pad % tile_b == 0 and tile_b % 8 == 0
    n_tiles = B_pad // tile_b

    lab_col = labels_p.reshape(B_pad, 1)
    lab_row = labels_p.reshape(1, B_pad)

    kernel = functools.partial(
        _circle_loss_kernel,
        scale=float(scale),
        margin=float(margin),
        batch=B,
        batch_padded=B_pad,
        tile_b=tile_b,
    )

    cost = pl.CostEstimate(
        flops=2 * B_pad * B_pad * D + 30 * B_pad * B_pad,
        transcendentals=2 * B_pad * B_pad + 8 * B_pad,
        bytes_accessed=B_pad * D * itemsize + 2 * B_pad * 4 + 4,
    )

    out = pl.pallas_call(
        kernel,
        out_shape=jax.ShapeDtypeStruct((1, 1), jnp.float32),
        grid_spec=pltpu.PrefetchScalarGridSpec(
            num_scalar_prefetch=0,
            grid=(n_tiles,),
            in_specs=[
                pl.BlockSpec((tile_b, 1), lambda i: (i, 0)),    # anchor labels tile
                pl.BlockSpec((1, B_pad), lambda i: (0, 0)),     # all labels (resident)
                pl.BlockSpec(memory_space=pl.ANY),              # embeddings, copied once
            ],
            out_specs=pl.BlockSpec(memory_space=pltpu.SMEM),
            scratch_shapes=[
                pltpu.VMEM((B_pad, D), e.dtype),                # single-buffered resident
                pltpu.SemaphoreType.DMA,
                pltpu.SMEM((2,), jnp.float32),
            ],
        ),
        compiler_params=pltpu.CompilerParams(
            # Scalar loss is a reduction carried across the anchor-tile axis.
            dimension_semantics=("arbitrary",),
            vmem_limit_bytes=vmem_budget,
        ),
        cost_estimate=cost,
    )(lab_col, lab_row, e)
    return out[0, 0]


def circle_loss_ref(embeds, labels, *, margin=0.4, scale=80.0,
                    normalize_embeds=True, mxu_dtype=jnp.float32):
    """Pure-JAX reference mirroring the PyTorch module (AllTripletsMiner)."""
    e = embeds.astype(jnp.float32)
    if normalize_embeds:
        e = e * lax.rsqrt(
            jnp.maximum(jnp.sum(e * e, axis=1, keepdims=True), 1e-24))
    B = e.shape[0]
    em = e.astype(mxu_dtype)
    sim = lax.dot_general(em, em, (((1,), (1,)), ((), ())),
                          preferred_element_type=jnp.float32)
    same = labels[:, None] == labels[None, :]
    eye = jnp.eye(B, dtype=bool)
    pos_mask = same & ~eye
    neg_mask = ~same
    ap_term = -scale * jax.nn.relu(1.0 + margin - sim) * (sim - 1.0 + margin)
    an_term = scale * jax.nn.relu(sim + margin) * (sim - margin)
    neg_big = jnp.float32(-1e30)
    lse_p = jax.nn.logsumexp(jnp.where(pos_mask, ap_term, neg_big), axis=1)
    lse_n = jax.nn.logsumexp(jnp.where(neg_mask, an_term, neg_big), axis=1)
    n_pos = jnp.sum(pos_mask, axis=1)
    n_neg = jnp.sum(neg_mask, axis=1)
    valid = (n_pos > 0) & (n_neg > 0)
    x = (lse_p + lse_n
         + jnp.log(jnp.maximum(n_pos, 1).astype(jnp.float32))
         + jnp.log(jnp.maximum(n_neg, 1).astype(jnp.float32)))
    loss_i = jnp.where(valid, jax.nn.softplus(x), 0.0)
    cnt = jnp.sum(valid)
    return jnp.where(cnt > 0,
                     jnp.sum(loss_i) / jnp.maximum(cnt, 1).astype(jnp.float32),
                     0.0)


if __name__ == "__main__":
    B, D = 8, 32
    key = jax.random.PRNGKey(0)
    embeds = jax.random.normal(key, (B, D), dtype=jnp.float32)
    # 4 classes, 2 samples each -> every anchor has positives and negatives.
    labels = jnp.array([0, 0, 1, 1, 2, 2, 3, 3], dtype=jnp.int32)

    # 1) f32 MXU path vs. f32 reference (tight tolerance).
    loss_f32 = circle_loss(embeds, labels, margin=0.4, scale=80.0,
                           normalize_embeds=True, mxu_dtype=jnp.float32)
    loss_f32 = jax.block_until_ready(loss_f32)
    ref_f32 = circle_loss_ref(embeds, labels, margin=0.4, scale=80.0,
                              normalize_embeds=True, mxu_dtype=jnp.float32)
    assert jnp.isfinite(loss_f32), f"non-finite loss: {loss_f32}"
    assert jnp.allclose(loss_f32, ref_f32, atol=2e-3, rtol=2e-4), (loss_f32, ref_f32)

    # 2) default bf16-operand MXU path vs. bf16-operand reference.
    loss_bf16 = circle_loss(embeds, labels, margin=0.4, scale=80.0,
                            normalize_embeds=True)
    loss_bf16 = jax.block_until_ready(loss_bf16)
    ref_bf16 = circle_loss_ref(embeds, labels, margin=0.4, scale=80.0,
                               normalize_embeds=True, mxu_dtype=jnp.bfloat16)
    assert jnp.isfinite(loss_bf16), f"non-finite loss: {loss_bf16}"
    assert jnp.allclose(loss_bf16, ref_bf16, atol=5e-2, rtol=1e-2), (loss_bf16, ref_bf16)

    print("KERNEL_OK")
</pallas_src>

<mosaic_0001>
module attributes {stable_mosaic.version = 11 : i64} {
  func.func @_circle_loss_kernel(%arg0: i32, %arg1: memref<128x1xi32, #tpu.memory_space<vmem>>, %arg2: memref<1x128xi32, #tpu.memory_space<vmem>>, %arg3: memref<128x32xf32, #tpu.memory_space<any>>, %arg4: memref<1x1xf32, #tpu.memory_space<smem>>, %arg5: memref<128x32xf32, #tpu.memory_space<vmem>>, %arg6: memref<!tpu.dma_semaphore, #tpu.memory_space<semaphore_mem>>, %arg7: memref<2xf32, #tpu.memory_space<smem>>) attributes {dimension_semantics = [#tpu.dimension_semantics<arbitrary>], iteration_bounds = array<i64: 1>, scalar_prefetch = 0 : i64, scratch_operands = 3 : i64, tpu.core_type = #tpu.core_type<tc>, window_params = [{transform_indices = @transform_0, window_bounds = array<i64: 128, 1>}, {pipeline_mode = #tpu.pipeline_mode<synchronous>, transform_indices = @transform_1, window_bounds = array<i64: 1, 128>}, {}, {transform_indices = @transform_3, window_bounds = array<i64: 1, 1>}]} {
    %c0_i32 = arith.constant 0 : i32
    %0 = arith.cmpi eq, %arg0, %c0_i32 : i32
    %1 = arith.extui %0 : i1 to i32
    %c0_i32_0 = arith.constant 0 : i32
    %2 = arith.cmpi ne, %1, %c0_i32_0 : i32
    scf.if %2 {
      tpu.enqueue_dma source(%arg3 : memref<128x32xf32, #tpu.memory_space<any>>) target(%arg5 : memref<128x32xf32, #tpu.memory_space<vmem>>) target_semaphore(%arg6 : memref<!tpu.dma_semaphore, #tpu.memory_space<semaphore_mem>>)
      %cst_43 = arith.constant 0.000000e+00 : f32
      %c0_44 = arith.constant 0 : index
      %128 = memref.load %arg7[%c0_44] : memref<2xf32, #tpu.memory_space<smem>>
      memref.store %cst_43, %arg7[%c0_44] : memref<2xf32, #tpu.memory_space<smem>>
      %cst_45 = arith.constant 0.000000e+00 : f32
      %c1_46 = arith.constant 1 : index
      %129 = memref.load %arg7[%c1_46] : memref<2xf32, #tpu.memory_space<smem>>
      memref.store %cst_45, %arg7[%c1_46] : memref<2xf32, #tpu.memory_space<smem>>
      tpu.wait_dma2 semaphore(%arg6 : memref<!tpu.dma_semaphore, #tpu.memory_space<semaphore_mem>>) src(%arg3 : memref<128x32xf32, #tpu.memory_space<any>>) dst(%arg5 : memref<128x32xf32, #tpu.memory_space<vmem>>)
    } else {
    }
    %c128_i32 = arith.constant 128 : i32
    %3 = arith.muli %arg0, %c128_i32 : i32
    %4 = tpu.assume_multiple %3, 128 : i32
    %5 = arith.index_cast %4 : i32 to index
    %c0 = arith.constant 0 : index
    %6 = vector.load %arg5[%5, %c0] : memref<128x32xf32, #tpu.memory_space<vmem>>, vector<128x32xf32>
    %c0_1 = arith.constant 0 : index
    %c0_2 = arith.constant 0 : index
    %7 = vector.load %arg5[%c0_1, %c0_2] : memref<128x32xf32, #tpu.memory_space<vmem>>, vector<128x32xf32>
    %cst = arith.constant dense<0.000000e+00> : vector<128x128xf32>
    %8 = tpu.matmul %6, %7, %cst {dimension_numbers = #tpu.dot_dimension_numbers<[1], [1], [0], [0], [0, 0, 1, 0], [], []>} : vector<128x32xf32>, vector<128x32xf32>, vector<128x128xf32> -> vector<128x128xf32>
    %c0_3 = arith.constant 0 : index
    %c0_4 = arith.constant 0 : index
    %9 = vector.load %arg1[%c0_3, %c0_4] : memref<128x1xi32, #tpu.memory_space<vmem>>, vector<128x1xi32>
    %c0_5 = arith.constant 0 : index
    %c0_6 = arith.constant 0 : index
    %10 = vector.load %arg2[%c0_5, %c0_6] : memref<1x128xi32, #tpu.memory_space<vmem>>, vector<1x128xi32>
    %11 = vector.broadcast %9 : vector<128x1xi32> to vector<128x128xi32>
    %12 = vector.broadcast %10 : vector<1x128xi32> to vector<128x128xi32>
    %13 = arith.cmpi eq, %11, %12 : vector<128x128xi32>
    %14 = tpu.iota {dimensions = array<i32: 0>} : vector<128x128xi32>
    %15 = vector.broadcast %4 : i32 to vector<128x128xi32>
    %16 = arith.addi %15, %14 : vector<128x128xi32>
    %17 = tpu.iota {dimensions = array<i32: 1>} : vector<128x128xi32>
    %18 = arith.cmpi ne, %16, %17 : vector<128x128xi32>
    %19 = arith.andi %13, %18 : vector<128x128xi1>
    %cst_7 = arith.constant dense<true> : vector<128x128xi1>
    %20 = arith.xori %13, %cst_7 : vector<128x128xi1>
    %c8_i32 = arith.constant 8 : i32
    %21 = vector.broadcast %c8_i32 : i32 to vector<128x128xi32>
    %22 = arith.cmpi slt, %17, %21 : vector<128x128xi32>
    %23 = arith.andi %19, %22 : vector<128x128xi1>
    %24 = arith.andi %20, %22 : vector<128x128xi1>
    %cst_8 = arith.constant 0.000000e+00 : f32
    %cst_9 = arith.constant 8.000000e+01 : f32
    %25 = arith.subf %cst_8, %cst_9 : f32
    %cst_10 = arith.constant 1.000000e+00 : f32
    %cst_11 = arith.constant 4.000000e-01 : f32
    %26 = arith.addf %cst_10, %cst_11 : f32
    %27 = vector.broadcast %26 : f32 to vector<128x128xf32>
    %28 = arith.subf %27, %8 : vector<128x128xf32>
    %cst_12 = arith.constant 0.000000e+00 : f32
    %29 = vector.broadcast %cst_12 : f32 to vector<128x128xf32>
    %30 = arith.maximumf %28, %29 : vector<128x128xf32>
    %31 = vector.broadcast %25 : f32 to vector<128x128xf32>
    %32 = arith.mulf %31, %30 : vector<128x128xf32>
    %cst_13 = arith.constant 1.000000e+00 : f32
    %33 = vector.broadcast %cst_13 : f32 to vector<128x128xf32>
    %34 = arith.subf %8, %33 : vector<128x128xf32>
    %cst_14 = arith.constant 4.000000e-01 : f32
    %35 = vector.broadcast %cst_14 : f32 to vector<128x128xf32>
    %36 = arith.addf %34, %35 : vector<128x128xf32>
    %37 = arith.mulf %32, %36 : vector<128x128xf32>
    %cst_15 = arith.constant 4.000000e-01 : f32
    %38 = vector.broadcast %cst_15 : f32 to vector<128x128xf32>
    %39 = arith.addf %8, %38 : vector<128x128xf32>
    %cst_16 = arith.constant 0.000000e+00 : f32
    %40 = vector.broadcast %cst_16 : f32 to vector<128x128xf32>
    %41 = arith.maximumf %39, %40 : vector<128x128xf32>
    %cst_17 = arith.constant 8.000000e+01 : f32
    %42 = vector.broadcast %cst_17 : f32 to vector<128x128xf32>
    %43 = arith.mulf %42, %41 : vector<128x128xf32>
    %cst_18 = arith.constant 4.000000e-01 : f32
    %44 = vector.broadcast %cst_18 : f32 to vector<128x128xf32>
    %45 = arith.subf %8, %44 : vector<128x128xf32>
    %46 = arith.mulf %43, %45 : vector<128x128xf32>
    %cst_19 = arith.constant -1.000000e+30 : f32
    %47 = vector.broadcast %cst_19 : f32 to vector<128x128xf32>
    %48 = arith.select %23, %37, %47 : vector<128x128xi1>, vector<128x128xf32>
    %cst_20 = arith.constant dense<0xFF800000> : vector<128xf32>
    %49 = vector.multi_reduction <maximumf>, %48, %cst_20 [1] : vector<128x128xf32> to vector<128xf32>
    %50 = vector.shape_cast %49 : vector<128xf32> to vector<128x1xf32>
    %51 = vector.broadcast %50 : vector<128x1xf32> to vector<128x128xf32>
    %52 = arith.subf %48, %51 : vector<128x128xf32>
    %53 = math.exp %52 : vector<128x128xf32>
    %cst_21 = arith.constant dense<0.000000e+00> : vector<128xf32>
    %54 = vector.multi_reduction <add>, %53, %cst_21 [1] : vector<128x128xf32> to vector<128xf32>
    %55 = vector.shape_cast %54 : vector<128xf32> to vector<128x1xf32>
    %cst_22 = arith.constant -1.000000e+30 : f32
    %56 = vector.broadcast %cst_22 : f32 to vector<128x128xf32>
    %57 = arith.select %24, %46, %56 : vector<128x128xi1>, vector<128x128xf32>
    %cst_23 = arith.constant dense<0xFF800000> : vector<128xf32>
    %58 = vector.multi_reduction <maximumf>, %57, %cst_23 [1] : vector<128x128xf32> to vector<128xf32>
    %59 = vector.shape_cast %58 : vector<128xf32> to vector<128x1xf32>
    %60 = vector.broadcast %59 : vector<128x1xf32> to vector<128x128xf32>
    %61 = arith.subf %57, %60 : vector<128x128xf32>
    %62 = math.exp %61 : vector<128x128xf32>
    %cst_24 = arith.constant dense<0.000000e+00> : vector<128xf32>
    %63 = vector.multi_reduction <add>, %62, %cst_24 [1] : vector<128x128xf32> to vector<128xf32>
    %64 = vector.shape_cast %63 : vector<128xf32> to vector<128x1xf32>
    %65 = arith.extui %23 : vector<128x128xi1> to vector<128x128xi32>
    %66 = arith.sitofp %65 : vector<128x128xi32> to vector<128x128xf32>
    %cst_25 = arith.constant dense<0.000000e+00> : vector<128xf32>
    %67 = vector.multi_reduction <add>, %66, %cst_25 [1] : vector<128x128xf32> to vector<128xf32>
    %68 = vector.shape_cast %67 : vector<128xf32> to vector<128x1xf32>
    %69 = arith.extui %24 : vector<128x128xi1> to vector<128x128xi32>
    %70 = arith.sitofp %69 : vector<128x128xi32> to vector<128x128xf32>
    %cst_26 = arith.constant dense<0.000000e+00> : vector<128xf32>
    %71 = vector.multi_reduction <add>, %70, %cst_26 [1] : vector<128x128xf32> to vector<128xf32>
    %72 = vector.shape_cast %71 : vector<128xf32> to vector<128x1xf32>
    %73 = math.log %55 : vector<128x1xf32>
    %74 = arith.addf %50, %73 : vector<128x1xf32>
    %75 = math.log %64 : vector<128x1xf32>
    %76 = arith.addf %59, %75 : vector<128x1xf32>
    %77 = arith.addf %74, %76 : vector<128x1xf32>
    %cst_27 = arith.constant 1.000000e+00 : f32
    %78 = vector.broadcast %cst_27 : f32 to vector<128x1xf32>
    %79 = arith.maximumf %68, %78 : vector<128x1xf32>
    %80 = math.log %79 : vector<128x1xf32>
    %81 = arith.addf %77, %80 : vector<128x1xf32>
    %cst_28 = arith.constant 1.000000e+00 : f32
    %82 = vector.broadcast %cst_28 : f32 to vector<128x1xf32>
    %83 = arith.maximumf %72, %82 : vector<128x1xf32>
    %84 = math.log %83 : vector<128x1xf32>
    %85 = arith.addf %81, %84 : vector<128x1xf32>
    %cst_29 = arith.constant 0.000000e+00 : f32
    %86 = vector.broadcast %cst_29 : f32 to vector<128x1xf32>
    %87 = arith.maximumf %85, %86 : vector<128x1xf32>
    %88 = math.absf %85 : vector<128x1xf32>
    %cst_30 = arith.constant 0.000000e+00 : f32
    %89 = vector.broadcast %cst_30 : f32 to vector<128x1xf32>
    %90 = arith.subf %89, %88 : vector<128x1xf32>
    %91 = math.exp %90 : vector<128x1xf32>
    %cst_31 = arith.constant 1.000000e+00 : f32
    %92 = vector.broadcast %cst_31 : f32 to vector<128x1xf32>
    %93 = arith.addf %92, %91 : vector<128x1xf32>
    %94 = math.log %93 : vector<128x1xf32>
    %95 = arith.addf %87, %94 : vector<128x1xf32>
    %cst_32 = arith.constant 0.000000e+00 : f32
    %96 = vector.broadcast %cst_32 : f32 to vector<128x1xf32>
    %97 = arith.cmpf ogt, %68, %96 : vector<128x1xf32>
    %cst_33 = arith.constant 0.000000e+00 : f32
    %98 = vector.broadcast %cst_33 : f32 to vector<128x1xf32>
    %99 = arith.cmpf ogt, %72, %98 : vector<128x1xf32>
    %100 = arith.andi %97, %99 : vector<128x1xi1>
    %101 = tpu.iota {dimensions = array<i32: 0>} : vector<128x1xi32>
    %102 = vector.broadcast %4 : i32 to vector<128x1xi32>
    %103 = arith.addi %102, %101 : vector<128x1xi32>
    %c8_i32_34 = arith.constant 8 : i32
    %104 = vector.broadcast %c8_i32_34 : i32 to vector<128x1xi32>
    %105 = arith.cmpi slt, %103, %104 : vector<128x1xi32>
    %106 = arith.andi %100, %105 : vector<128x1xi1>
    %cst_35 = arith.constant 0.000000e+00 : f32
    %107 = vector.broadcast %cst_35 : f32 to vector<128x1xf32>
    %108 = arith.select %106, %95, %107 : vector<128x1xi1>, vector<128x1xf32>
    %c0_36 = arith.constant 0 : index
    %109 = memref.load %arg7[%c0_36] : memref<2xf32, #tpu.memory_space<smem>>
    %110 = vector.shape_cast %108 : vector<128x1xf32> to vector<1x128x1xf32>
    %cst_37 = arith.constant dense<0.000000e+00> : vector<1xf32>
    %111 = vector.multi_reduction <add>, %110, %cst_37 [1, 2] : vector<1x128x1xf32> to vector<1xf32>
    %112 = vector.shape_cast %111 : vector<1xf32> to vector<1x1x1xf32>
    %113 = vector.extract %112[0, 0, 0] : f32 from vector<1x1x1xf32>
    %114 = arith.addf %109, %113 : f32
    %c0_38 = arith.constant 0 : index
    %115 = memref.load %arg7[%c0_38] : memref<2xf32, #tpu.memory_space<smem>>
    memref.store %114, %arg7[%c0_38] : memref<2xf32, #tpu.memory_space<smem>>
    %c1 = arith.constant 1 : index
    %116 = memref.load %arg7[%c1] : memref<2xf32, #tpu.memory_space<smem>>
    %117 = arith.extui %106 : vector<128x1xi1> to vector<128x1xi32>
    %118 = arith.sitofp %117 : vector<128x1xi32> to vector<128x1xf32>
    %119 = vector.shape_cast %118 : vector<128x1xf32> to vector<1x128x1xf32>
    %cst_39 = arith.constant dense<0.000000e+00> : vector<1xf32>
    %120 = vector.multi_reduction <add>, %119, %cst_39 [1, 2] : vector<1x128x1xf32> to vector<1xf32>
    %121 = vector.shape_cast %120 : vector<1xf32> to vector<1x1x1xf32>
    %122 = vector.extract %121[0, 0, 0] : f32 from vector<1x1x1xf32>
    %123 = arith.addf %116, %122 : f32
    %c1_40 = arith.constant 1 : index
    %124 = memref.load %arg7[%c1_40] : memref<2xf32, #tpu.memory_space<smem>>
    memref.store %123, %arg7[%c1_40] : memref<2xf32, #tpu.memory_space<smem>>
    %c0_i32_41 = arith.constant 0 : i32
    %125 = arith.cmpi eq, %arg0, %c0_i32_41 : i32
    %126 = arith.extui %125 : i1 to i32
    %c0_i32_42 = arith.constant 0 : i32
    %127 = arith.cmpi ne, %126, %c0_i32_42 : i32
    scf.if %127 {
      %c0_43 = arith.constant 0 : index
      %128 = memref.load %arg7[%c0_43] : memref<2xf32, #tpu.memory_space<smem>>
      %c1_44 = arith.constant 1 : index
      %129 = memref.load %arg7[%c1_44] : memref<2xf32, #tpu.memory_space<smem>>
      %cst_45 = arith.constant 0.000000e+00 : f32
      %130 = arith.cmpf ogt, %129, %cst_45 : f32
      %cst_46 = arith.constant 1.000000e+00 : f32
      %131 = arith.maximumf %129, %cst_46 : f32
      %132 = arith.divf %128, %131 : f32
      %cst_47 = arith.constant 0.000000e+00 : f32
      %133 = arith.select %130, %132, %cst_47 : f32
      %c0_48 = arith.constant 0 : index
      %c0_49 = arith.constant 0 : index
      %134 = memref.load %arg4[%c0_48, %c0_49] : memref<1x1xf32, #tpu.memory_space<smem>>
      memref.store %133, %arg4[%c0_48, %c0_49] : memref<1x1xf32, #tpu.memory_space<smem>>
    } else {
    }
    return
  }
  func.func @transform_0(%arg0: i32) -> (i32, i32) {
    %c0_i32 = arith.constant 0 : i32
    %c0_i32_0 = arith.constant 0 : i32
    return %arg0, %c0_i32 : i32, i32
  }
  func.func @transform_1(%arg0: i32) -> (i32, i32) {
    %c0_i32 = arith.constant 0 : i32
    %c0_i32_0 = arith.constant 0 : i32
    %c0_i32_1 = arith.constant 0 : i32
    return %c0_i32, %c0_i32_0 : i32, i32
  }
  func.func @transform_3(%arg0: i32) -> (i32, i32) {
    %c0_i32 = arith.constant 0 : i32
    %c0_i32_0 = arith.constant 0 : i32
    %c0_i32_1 = arith.constant 0 : i32
    return %c0_i32, %c0_i32_0 : i32, i32
  }
}

</mosaic_0001>

<bundles_post_ra>
// kernel: tpu_custom_call.1
= control target key start
LH: loop header
LB: loop body
LE: loop exit
PB: predicated region body
PF: predicated region fallthrough
CT: control target
= control target key end

     0   :  { %8 = vsyncpa [#allocation6], 0  ;;  %s2175_s0 = inlined_call_operand.vmem [shape: s32[128,1], index: 0, kind: input, shape index: {}]   ;;  %s2176_s1 = inlined_call_operand.vmem [shape: s32[1,128], index: 1, kind: input, shape index: {}]   ;;  %s2177_s2 = inlined_call_operand.vmem [shape: f32[128,32], index: 2, kind: input, shape index: {}]   ;;  %s2178_s3 = inlined_call_operand.hbm [shape: f32[1,1], index: 3, kind: output, shape index: {}]  }
   0x1   :  { %v1903_v0 = vld [vmem:[%s2177_s2] sm:$0xff]  ;;  %v1908_v1 = vld [vmem:[%s2177_s2 + $0x8] sm:$0xff]  ;;  %v1913_v2 = vld [vmem:[%s2177_s2 + $0x10] sm:$0xff] }
   0x2   :  { %v1918_v3 = vld [vmem:[%s2177_s2 + $0x18] sm:$0xff]  ;;  %v1923_v4 = vld [vmem:[%s2177_s2 + $0x20] sm:$0xff]  ;;  %v1928_v5 = vld [vmem:[%s2177_s2 + $0x28] sm:$0xff] }
   0x3   :  { %v1933_v6 = vld [vmem:[%s2177_s2 + $0x30] sm:$0xff]  ;;  %v1938_v7 = vld [vmem:[%s2177_s2 + $0x38] sm:$0xff]  ;;  %v1943_v8 = vld [vmem:[%s2177_s2 + $0x40] sm:$0xff] }
   0x4   :  { %v1948_v9 = vld [vmem:[%s2177_s2 + $0x48] sm:$0xff]  ;;  %v1953_v10 = vld [vmem:[%s2177_s2 + $0x50] sm:$0xff]  ;;  %v1958_v11 = vld [vmem:[%s2177_s2 + $0x58] sm:$0xff] }
   0x5   :  { %v1963_v12 = vld [vmem:[%s2177_s2 + $0x60] sm:$0xff]  ;;  %v1968_v13 = vld [vmem:[%s2177_s2 + $0x68] sm:$0xff]  ;;  %v1973_v14 = vld [vmem:[%s2177_s2 + $0x70] sm:$0xff] }
   0x6   :  { %v1978_v15 = vld [vmem:[%s2177_s2 + $0x78] sm:$0xff] }
   0x7   :  { %64 = vsyncadd [#allocation3], 2048  ;;  %vm106_vm0 = vcmask 261120  }
   0x8   :  { %1871 = dma.done.wait [#allocation3], 2048 }
   0x9   :  { %1872 = vsyncadd [#allocation3], 4294965248  ;;  %1680 = vmatpush.xpose.msk.msra.mxu0 %vm106_vm0, %v1978_v15  ;;  %1781 = vmatpush.xpose.msk.msra.mxu2 %vm106_vm0, %v1978_v15  ;;  %v268_v16 = vld [vmem:[%s2175_s0] sm:$0xff]  ;;  %v1875_v17 = vmov 0   ;;  %v350_v18 = vlaneseq  ;;  %vm1876_vm3 = vmmov 1   ;;  %v1877_v62 = vmov 0.0  }
   0xa   :  { %1782 = vmatpush.xpose.msk.msra.mxu3 %vm106_vm0, %v1978_v15  ;;  %1780 = vmatpush.xpose.msk.msra.mxu1 %vm106_vm0, %v1978_v15  ;;  %v1840_v19 = vld [vmem:[%s2176_s1] ss:$0 sm:$0xff]  ;;  %vm1508_vm11 = vcmask 7168   ;;  %s1878_s20 = smov 1.0   ;;  %s1660_s24 = sshll.u32 %s2178_s3, 4  ;;  %s1661_s24 = int_to_ptr.hbm [resolvable:$true] %s1660_s24 }
   0xb   :  { %1839 = vset.pattern.permute.xlu0 %v1875_v17  ;;  %v351_v20 = vshrl.u32 %v350_v18, 7  ;;  %v385_v21 = vand.u32 127, %v350_v18  ;;  %s1879_s27 = smov [#allocation5]  }
   0xc   :  { %286 = vperm.xlu0 %1839, %v268_v16  }
   0xd   :  { %1681 = vmatpush.xpose.msk.msra.mxu0 %vm106_vm0, %v1973_v14  ;;  %1784 = vmatpush.xpose.msk.msra.mxu2 %vm106_vm0, %v1973_v14  ;;  %vm386_vm2 = vcmp.ne.s32.totalorder %v351_v20, %v385_v21  ;;  %vm434_vm5 = vcmp.lt.s32.totalorder %v385_v21, 8 }
   0xe   :  { %1785 = vmatpush.xpose.msk.msra.mxu3 %vm106_vm0, %v1973_v14  ;;  %1783 = vmatpush.xpose.msk.msra.mxu1 %vm106_vm0, %v1973_v14 }
  0x11   :  { %1682 = vmatpush.xpose.msk.msra.mxu0 %vm106_vm0, %v1968_v13  ;;  %1787 = vmatpush.xpose.msk.msra.mxu2 %vm106_vm0, %v1968_v13 }
  0x12   :  { %1788 = vmatpush.xpose.msk.msra.mxu3 %vm106_vm0, %v1968_v13  ;;  %1786 = vmatpush.xpose.msk.msra.mxu1 %vm106_vm0, %v1968_v13 }
  0x15   :  { %1683 = vmatpush.xpose.msk.msra.mxu0 %vm106_vm0, %v1963_v12  ;;  %1790 = vmatpush.xpose.msk.msra.mxu2 %vm106_vm0, %v1963_v12 }
  0x16   :  { %1791 = vmatpush.xpose.msk.msra.mxu3 %vm106_vm0, %v1963_v12  ;;  %1789 = vmatpush.xpose.msk.msra.mxu1 %vm106_vm0, %v1963_v12 }
  0x19   :  { %1684 = vmatpush.xpose.msk.msra.mxu0 %vm106_vm0, %v1958_v11  ;;  %1793 = vmatpush.xpose.msk.msra.mxu2 %vm106_vm0, %v1958_v11 }
  0x1a   :  { %1794 = vmatpush.xpose.msk.msra.mxu3 %vm106_vm0, %v1958_v11  ;;  %1792 = vmatpush.xpose.msk.msra.mxu1 %vm106_vm0, %v1958_v11 }
  0x1d   :  { %1685 = vmatpush.xpose.msk.msra.mxu0 %vm106_vm0, %v1953_v10  ;;  %1796 = vmatpush.xpose.msk.msra.mxu2 %vm106_vm0, %v1953_v10 }
  0x1e   :  { %1797 = vmatpush.xpose.msk.msra.mxu3 %vm106_vm0, %v1953_v10  ;;  %1795 = vmatpush.xpose.msk.msra.mxu1 %vm106_vm0, %v1953_v10 }
  0x21   :  { %1686 = vmatpush.xpose.msk.msra.mxu0 %vm106_vm0, %v1948_v9  ;;  %1799 = vmatpush.xpose.msk.msra.mxu2 %vm106_vm0, %v1948_v9 }
  0x22   :  { %1800 = vmatpush.xpose.msk.msra.mxu3 %vm106_vm0, %v1948_v9  ;;  %1798 = vmatpush.xpose.msk.msra.mxu1 %vm106_vm0, %v1948_v9 }
  0x25   :  { %1687 = vmatpush.xpose.msk.msra.mxu0 %vm106_vm0, %v1943_v8  ;;  %1802 = vmatpush.xpose.msk.msra.mxu2 %vm106_vm0, %v1943_v8 }
  0x26   :  { %1803 = vmatpush.xpose.msk.msra.mxu3 %vm106_vm0, %v1943_v8  ;;  %1801 = vmatpush.xpose.msk.msra.mxu1 %vm106_vm0, %v1943_v8 }
  0x29   :  { %1688 = vmatpush.xpose.msk.msra.mxu0 %vm106_vm0, %v1938_v7  ;;  %1805 = vmatpush.xpose.msk.msra.mxu2 %vm106_vm0, %v1938_v7 }
  0x2a   :  { %1806 = vmatpush.xpose.msk.msra.mxu3 %vm106_vm0, %v1938_v7  ;;  %1804 = vmatpush.xpose.msk.msra.mxu1 %vm106_vm0, %v1938_v7 }
  0x2d   :  { %1689 = vmatpush.xpose.msk.msra.mxu0 %vm106_vm0, %v1933_v6  ;;  %1808 = vmatpush.xpose.msk.msra.mxu2 %vm106_vm0, %v1933_v6 }
  0x2e   :  { %1809 = vmatpush.xpose.msk.msra.mxu3 %vm106_vm0, %v1933_v6  ;;  %1807 = vmatpush.xpose.msk.msra.mxu1 %vm106_vm0, %v1933_v6 }
  0x31   :  { %1690 = vmatpush.xpose.msk.msra.mxu0 %vm106_vm0, %v1928_v5  ;;  %1811 = vmatpush.xpose.msk.msra.mxu2 %vm106_vm0, %v1928_v5 }
  0x32   :  { %1812 = vmatpush.xpose.msk.msra.mxu3 %vm106_vm0, %v1928_v5  ;;  %1810 = vmatpush.xpose.msk.msra.mxu1 %vm106_vm0, %v1928_v5 }
  0x35   :  { %1691 = vmatpush.xpose.msk.msra.mxu0 %vm106_vm0, %v1923_v4  ;;  %1814 = vmatpush.xpose.msk.msra.mxu2 %vm106_vm0, %v1923_v4 }
  0x36   :  { %1815 = vmatpush.xpose.msk.msra.mxu3 %vm106_vm0, %v1923_v4  ;;  %1813 = vmatpush.xpose.msk.msra.mxu1 %vm106_vm0, %v1923_v4 }
  0x39   :  { %1692 = vmatpush.xpose.msk.msra.mxu0 %vm106_vm0, %v1918_v3  ;;  %1817 = vmatpush.xpose.msk.msra.mxu2 %vm106_vm0, %v1918_v3 }
  0x3a   :  { %1818 = vmatpush.xpose.msk.msra.mxu3 %vm106_vm0, %v1918_v3  ;;  %1816 = vmatpush.xpose.msk.msra.mxu1 %vm106_vm0, %v1918_v3 }
  0x3d   :  { %1693 = vmatpush.xpose.msk.msra.mxu0 %vm106_vm0, %v1913_v2  ;;  %1820 = vmatpush.xpose.msk.msra.mxu2 %vm106_vm0, %v1913_v2 }
  0x3e   :  { %1821 = vmatpush.xpose.msk.msra.mxu3 %vm106_vm0, %v1913_v2  ;;  %1819 = vmatpush.xpose.msk.msra.mxu1 %vm106_vm0, %v1913_v2 }
  0x41   :  { %1694 = vmatpush.xpose.msk.msra.mxu0 %vm106_vm0, %v1908_v1  ;;  %1823 = vmatpush.xpose.msk.msra.mxu2 %vm106_vm0, %v1908_v1 }
  0x42   :  { %1824 = vmatpush.xpose.msk.msra.mxu3 %vm106_vm0, %v1908_v1  ;;  %1822 = vmatpush.xpose.msk.msra.mxu1 %vm106_vm0, %v1908_v1 }
  0x45   :  { %1695 = vmatpush.xpose.msk.msra.mxu0 %vm106_vm0, %v1903_v0  ;;  %1826 = vmatpush.xpose.msk.msra.mxu2 %vm106_vm0, %v1903_v0 }
  0x46   :  { %1827 = vmatpush.xpose.msk.msra.mxu3 %vm106_vm0, %v1903_v0  ;;  %1825 = vmatpush.xpose.msk.msra.mxu1 %vm106_vm0, %v1903_v0 }
  0x48   :  { %1696 = vmatmul.msk.f32.vlgmr.msra.gmra.mxu0 %vm106_vm0, %v1903_v0  ;;  %1704 = vmatmul.msk.f32.vlgmr.msra.gmra.mxu2 %vm106_vm0, %v1943_v8 }
  0x49   :  { %1708 = vmatmul.msk.f32.vlgmr.msra.gmra.mxu3 %vm106_vm0, %v1963_v12  ;;  %1700 = vmatmul.msk.f32.vlgmr.msra.gmra.mxu1 %vm106_vm0, %v1923_v4 }
  0x50   :  { %1697 = vmatmul.msk.f32.gmra.mxu0 %vm106_vm0, %v1908_v1  ;;  %1705 = vmatmul.msk.f32.gmra.mxu2 %vm106_vm0, %v1948_v9 }
  0x51   :  { %1709 = vmatmul.msk.f32.gmra.mxu3 %vm106_vm0, %v1968_v13  ;;  %1701 = vmatmul.msk.f32.gmra.mxu1 %vm106_vm0, %v1928_v5 }
  0x58   :  { %1698 = vmatmul.msk.f32.gmra.mxu0 %vm106_vm0, %v1913_v2  ;;  %1706 = vmatmul.msk.f32.gmra.mxu2 %vm106_vm0, %v1953_v10 }
  0x59   :  { %1710 = vmatmul.msk.f32.gmra.mxu3 %vm106_vm0, %v1973_v14  ;;  %1702 = vmatmul.msk.f32.gmra.mxu1 %vm106_vm0, %v1933_v6 }
  0x60   :  { %1699 = vmatmul.msk.f32.gmra.mxu0 %vm106_vm0, %v1918_v3  ;;  %1707 = vmatmul.msk.f32.gmra.mxu2 %vm106_vm0, %v1958_v11 }
  0x61   :  { %1711 = vmatmul.msk.f32.gmra.mxu3 %vm106_vm0, %v1978_v15  ;;  %1703 = vmatmul.msk.f32.gmra.mxu1 %vm106_vm0, %v1938_v7 }
  0x7e   :  { %v287_v22 = vpop.permute.xlu0 %286 }
  0x7f   :  { %vm334_vm1 = vcmp.eq.s32.totalorder %v287_v22, %v1840_v19 }
  0x80   :  { %vm418_vm4 = vmxor %vm334_vm1, %vm1876_vm3 }
  0x81   :  { %vm402_vm6 = vmand %vm334_vm1, %vm386_vm2 }
  0x82   :  { %vm2146_vm7 = vmand %vm418_vm4, %vm434_vm5 }
  0x83   :  { %vm2150_vm8 = vmand %vm402_vm6, %vm434_vm5  ;;  %v1760_v63 = vsel %vm2146_vm7, 1.0, %v1877_v62 }
  0x84   :  { %v1744_v0 = vsel %vm2150_vm8, 1.0, %v1877_v62 }
  0xc5   :  { %v220_v23 = vpop.f32.mrf.mxu0 }
  0xc6   :  { %v563_v24 = vadd.f32 0.4, %v220_v23  ;;  %v467_v25 = vsub.f32 1.4, %v220_v23  ;;  %v1712_v26 = vadd.f32 -1.0, %v220_v23  ;;  %v232_v27 = vpop.f32.mrf.mxu1 }
  0xc7   :  { %v1728_v32 = vadd.f32 -0.4, %v220_v23 }
  0xc8   :  { %v579_v28 = vmax.f32 %v563_v24, 0.0  ;;  %v483_v29 = vmax.f32 %v467_v25, 0.0  ;;  %v531_v34 = vadd.f32 0.4, %v1712_v26 }
  0xca   :  { %v595_v31 = vmul.f32 80.0, %v579_v28  ;;  %v499_v33 = vmul.f32 -80.0, %v483_v29 }
  0xcb   :  { %v244_v38 = vpop.f32.mrf.mxu2 }
  0xcc   :  { %v627_v36 = vmul.f32 %v1728_v32, %v595_v31  ;;  %v547_v37 = vmul.f32 %v531_v34, %v499_v33  ;;  %v256_v39 = vpop.f32.mrf.mxu3 }
  0xcd   :  { %v223_v40 = vpop.f32.mrf.mxu0 }
  0xce   :  { %v771_v41 = vsel %vm2146_vm7, %v627_v36, -1e+30  ;;  %v643_v42 = vsel %vm2150_vm8, %v547_v37, -1e+30  ;;  %v235_v43 = vpop.f32.mrf.mxu1 }
  0xcf   :  { %787 = vmax.xlane.f32.xlu1 %v771_v41  ;;  %659 = vmax.xlane.f32.xlu0 %v643_v42 }
  0xd3   :  { %v247_v44 = vpop.f32.mrf.mxu2 }
  0xd4   :  { %v259_v45 = vpop.f32.mrf.mxu3 }
  0xd5   :  { %v226_v46 = vpop.f32.mrf.mxu0 }
  0xd6   :  { %v238_v47 = vpop.f32.mrf.mxu1 }
  0xdb   :  { %v250_v48 = vpop.f32.mrf.mxu2 }
  0xdc   :  { %v262_v49 = vpop.f32.mrf.mxu3 }
  0xdd   :  { %v229_v50 = vpop.f32.mrf.mxu0 }
  0xde   :  { %v241_v51 = vpop.f32.mrf.mxu1 }
  0xe3   :  { %v253_v52 = vpop.f32.mrf.mxu2 }
  0xe4   :  { %v265_v53 = vpop.f32.mrf.mxu3 }
 0x142   :  { %v788_v54 = vpop.xlane.xlu1 %787  ;;  %v660_v55 = vpop.xlane.xlu0 %659 }
 0x143   :  { %v819_v56 = vsub.f32 %v771_v41, %v788_v54  ;;  %v691_v57 = vsub.f32 %v643_v42, %v660_v55 }
 0x145   :  { %v707_v58 = vmul.f32 1.442695, %v691_v57  ;;  %v835_v59 = vmul.f32 1.442695, %v819_v56 }
 0x147   :  { %1841 = vpow2.f32 %v707_v58 }
 0x148   :  { %1843 = vpow2.f32 %v835_v59 }
 0x14d   :  { %v1842_v60 = vpop.eup %1841 }
 0x14e   :  { %v1844_v61 = vpop.eup %1843  ;;  %739 = vadd.xlane.f32.xlu1 %v1842_v60 }
 0x14f   :  { %867 = vadd.xlane.f32.xlu2 %v1844_v61 }
 0x156   :  { %995 = vadd.xlane.f32.xlu1 %v1760_v63 }
 0x157   :  { %931 = vadd.xlane.f32.xlu2 %v1744_v0 }
 0x1c1   :  { %v740_v1 = vpop.xlane.xlu1 %739 }
 0x1c2   :  { %v868_v2 = vpop.xlane.xlu2 %867  ;;  %1845 = vlog2.f32 %v740_v1 }
 0x1c3   :  { %1847 = vlog2.f32 %v868_v2 }
 0x1c8   :  { %v1846_v3 = vpop.eup %1845 }
 0x1c9   :  { %v1848_v4 = vpop.eup %1847  ;;  %v996_v5 = vpop.xlane.xlu1 %995  ;;  %v1028_v10 = vmul.f32 0.6931472, %v1846_v3 }
 0x1ca   :  { %v932_v6 = vpop.xlane.xlu2 %931  ;;  %v1203_v7 = vmax.f32 %v996_v5, 1.0  ;;  %vm1427_vm9 = vcmp.gt.f32.partialorder %v996_v5, 0.0  ;;  %v1076_v9 = vmul.f32 0.6931472, %v1848_v4 }
 0x1cb   :  { %v1139_v8 = vmax.f32 %v932_v6, 1.0  ;;  %vm1411_vm10 = vcmp.gt.f32.partialorder %v932_v6, 0.0  ;;  %v1059_v15 = vadd.f32 %v1028_v10, %v660_v55 }
 0x1cc   :  { %1849 = vlog2.f32 %v1203_v7  ;;  %vm2162_vm12 = vmand %vm1411_vm10, %vm1427_vm9  ;;  %v1107_v14 = vadd.f32 %v1076_v9, %v788_v54 }
 0x1cd   :  { %1851 = vlog2.f32 %v1139_v8  ;;  %v1777_v12 = vsel %vm2162_vm12, 1.0, %v1877_v62 }
 0x1ce   :  { %v1585_v13 = vsel %vm1508_vm11, %v1777_v12, 0.0  ;;  %v1123_v18 = vadd.f32 %v1107_v14, %v1059_v15 }
 0x1cf   :  { %1616 = vadd.xlane.f32.xlu1 %v1585_v13 }
 0x1d2   :  { %v1850_v16 = vpop.eup %1849 }
 0x1d3   :  { %v1852_v17 = vpop.eup %1851  ;;  %v1220_v21 = vmul.f32 0.6931472, %v1850_v16 }
 0x1d4   :  { %v1156_v19 = vmul.f32 0.6931472, %v1852_v17 }
 0x1d6   :  { %v1187_v20 = vadd.f32 %v1156_v19, %v1123_v18 }
 0x1d8   :  { %v1251_v22 = vadd.f32 %v1220_v21, %v1187_v20 }
 0x1da   :  { %v1283_v23 = vand.u32 2147483647, %v1251_v22  ;;  %v1267_v29 = vmax.f32 %v1251_v22, 0.0 }
 0x1dc   :  { %v1299_v24 = vsub.f32 0.0, %v1283_v23 }
 0x1de   :  { %v1315_v25 = vmul.f32 1.442695, %v1299_v24 }
 0x1e0   :  { %1853 = vpow2.f32 %v1315_v25 }
 0x1e6   :  { %v1854_v26 = vpop.eup %1853 }
 0x1e7   :  { %v1347_v27 = vadd.f32 1.0, %v1854_v26 }
 0x1e9   :  { %1855 = vlog2.f32 %v1347_v27 }
 0x1ef   :  { %v1856_v28 = vpop.eup %1855 }
 0x1f0   :  { %v1364_v30 = vmul.f32 0.6931472, %v1856_v28 }
 0x1f2   :  { %v1395_v31 = vadd.f32 %v1364_v30, %v1267_v29 }
 0x1f4   :  { %v1491_v32 = vsel %vm2162_vm12, %v1395_v31, 0.0 }
 0x1f5   :  { %v1509_v33 = vsel %vm1508_vm11, %v1491_v32, 0.0 }
 0x1f6   :  { %1540 = vadd.xlane.f32.xlu2 %v1509_v33 }
 0x242   :  { %v1617_v34 = vpop.xlane.xlu1 %1616 }
 0x243   :  { %v1618_v35 = vrot.slane %v1617_v34, 4 }
 0x245   :  { %v1619_v36 = vadd.f32 %v1618_v35, %v1617_v34 }
 0x247   :  { %v1620_v37 = vrot.slane %v1619_v36, 2 }
 0x249   :  { %v1621_v41 = vadd.f32 %v1620_v37, %v1619_v36 }
 0x24b   :  { %v1622_v44 = vrot.slane %v1621_v41, 1 }
 0x24d   :  { %v1623_v47 = vadd.f32 %v1622_v44, %v1621_v41 }
 0x269   :  { %v1541_v38 = vpop.xlane.xlu2 %1540 }
 0x26a   :  { %v1542_v39 = vrot.slane %v1541_v38, 4 }
 0x26c   :  { %v1543_v40 = vadd.f32 %v1542_v39, %v1541_v38 }
 0x26e   :  { %v1544_v42 = vrot.slane %v1543_v40, 2 }
 0x270   :  { %v1545_v43 = vadd.f32 %v1544_v42, %v1543_v40 }
 0x272   :  { %v1546_v45 = vrot.slane %v1545_v43, 1 }
 0x274   :  { %v1547_v46 = vadd.f32 %v1546_v45, %v1545_v43 }
 0x276   :  { %1828 = vpush %v1547_v46 }
 0x277   :  { %1830 = vpush %v1623_v47 }
 0x2a7   :  { %s1829_s1 = spop %1828 }
 0x2a8   :  { %s1831_s19 = spop %1830 }
 0x2a9   :  { %s1634_s21 = smax.f32 %s1878_s20, %s1831_s19  ;;  %p1633_p0 = scmp.gt.f32.partialorder %s1831_s19, 0.0 }
 0x2aa   :  { %v1635_v48 = vstv %s1634_s21 }
 0x2ab   :  { %1857 = vrcp.f32 %v1635_v48  ;;  %v1647_v52 = vand.u32 2147483648, %v1635_v48  ;;  %v1645_v54 = vand.u32 2147483647, %v1635_v48  ;;  %vm1641_vm14 = vweird.f32 %v1635_v48 }
 0x2ad   :  { %v1648_v56 = vor.u32 1.1754944e-38, %v1647_v52  ;;  %vm1646_vm0 = vcmp.eq.f32.partialorder %v1645_v54, 8.507059e+37 }
 0x2b1   :  { %v1858_v49 = vpop.eup %1857 }
 0x2b2   :  { %v1637_v50 = vmul.f32 %v1858_v49, %v1635_v48  ;;  %vm1642_vm13 = vweird.f32 %v1858_v49 }
 0x2b3   :  { %vm1643_vm15 = vmor %vm1641_vm14, %vm1642_vm13 }
 0x2b4   :  { %v1638_v51 = vsub.f32 1.0, %v1637_v50 }
 0x2b6   :  { %v1639_v53 = vmul.f32 %v1858_v49, %v1638_v51 }
 0x2b8   :  { %v1640_v55 = vadd.f32 %v1858_v49, %v1639_v53 }
 0x2ba   :  { %v1644_v57 = vsel %vm1643_vm15, %v1858_v49, %v1640_v55 }
 0x2bb   :  { %v1649_v58 = vsel %vm1646_vm0, %v1648_v56, %v1644_v57 }
 0x2bc   :  { %1832 = vpush %v1649_v58 }
 0x2ed   :  { %s1833_s25 = spop %1832 }
 0x2ee   :  { %s1651_s26 = smul.f32 %s1833_s25, %s1829_s1 }
 0x2f0   :  { %s2186_s26 = smov (!%p1633_p0, %s1651_s26), 0.0 }
 0x2f1   :  { %1654 = sst [smem:[#allocation5]] %s2186_s26 }
 0x2f2   :  { %1663 = dma.smem_to_hbm %s1879_s27, 16, %s1661_s24, [#allocation6]  }
 0x2f3   :  { %1873 = dma.done.wait [#allocation6], 16  }
 0x2f4   :  { %1874 = vsyncadd [#allocation6], 4294967280 }
 0x2f5   :  { %1668 = sfence }
 0x2f6   :  { %1669 = vsyncpa [#allocation6], 1 }
 0x2f7   :  { %1670 = vsyncmov [#allocation3] }
 0x2fa   :  { %s1671_s28 = vpop.sfrf %1670 }
 0x2fb   :  { %p1779_p1 = scmp.ne.s32.totalorder %s1671_s28, 0 }
 0x2fd   :  { %1675 = shalt.err (%p1779_p1)  }

</bundles_post_ra>
